<compile_context>
chip_gen: v7x
topology: tpu7x:2x2x1
jax: 0.10.0
libtpu: 0.0.40
codegen_flags: <defaults>
</compile_context>

<pallas_src>
import math

import jax
import jax.numpy as jnp
from jax.experimental import pallas as pl
from jax.experimental.pallas import tpu as pltpu

CLASSWEIGHT = 2.0    # args.classweight  (CE weight = [1.0, classweight])
SMOOTH = 1.0         # DiceLoss smooth
_LN2 = math.log(2.0)

# <= ~2 MiB f32 per (sublane-padded) input plane per buffer.
# Resident VMEM ~= 3 planes * 2 bufs + 4 accumulator planes ~= 10 * 2 MiB = 20 MiB,
# safely under v7x's 64 MiB physical VMEM (and 128 MiB on v5e/v6e).
_PLANE_ELEMS = 512 * 1024
_VMEM_LIMIT_BYTES = 48 * 1024 * 1024


def _loss_kernel(p0_ref, p1_ref, t1_ref, out_ref, acc_ref):
    """Streaming partial sums for weighted 2-class CE + Dice.

    p0_ref, p1_ref : (nb, tp)   class-0 / class-1 logits
    t1_ref         : (nb, tp)   class-1 plane of the one-hot targets (exact 0/1)
    out_ref        : (1, 4, 128) per-slice reduced sums (lane-broadcast), written once
    acc_ref        : (4, nb, tp) VMEM accumulator:
                     [0] w*nll  [1] cls1  [2] sigmoid*onehot  [3] sigmoid0+sigmoid1
    """
    i = pl.program_id(1)
    j = pl.program_id(2)

    @pl.when((i == 0) & (j == 0))
    def _init():
        acc_ref[...] = jnp.zeros_like(acc_ref)

    p0 = p0_ref[...].astype(jnp.float32)
    p1 = p1_ref[...].astype(jnp.float32)
    cls1 = t1_ref[...].astype(jnp.float32)        # one-hot -> already exactly 0.0/1.0

    # Weighted CE via stable 2-class log-sum-exp (one exp + one log per pixel):
    #   nll = relu(p1-p0) - cls1*(p1-p0) + log(1 + exp(-|p1-p0|))
    diff = p1 - p0
    soft = jnp.log(1.0 + jnp.exp(-jnp.abs(diff)))
    nll = jnp.maximum(diff, 0.0) - cls1 * diff + soft
    w = 1.0 + (CLASSWEIGHT - 1.0) * cls1

    # sigmoid via the single-EUP tanh form
    s0 = 0.5 * jnp.tanh(0.5 * p0) + 0.5
    s1 = 0.5 * jnp.tanh(0.5 * p1) + 0.5

    acc_ref[0, :, :] += w * nll                    # CE numerator
    acc_ref[1, :, :] += cls1                       # -> CE weight denominator
    acc_ref[2, :, :] += s0 + cls1 * (s1 - s0)      # dice intersection
    acc_ref[3, :, :] += s0 + s1                    # dice sigmoid sum

    @pl.when((i == pl.num_programs(1) - 1) & (j == pl.num_programs(2) - 1))
    def _finalize():
        # Once per slice: fold the wide accumulator to 4 scalars (XLU) and emit a
        # tiny lane-dense output block (all 128 lanes carry the same value).
        for k in range(4):
            plane = acc_ref[k, :, :]                      # (nb, tp)
            r = jnp.sum(plane, axis=1, keepdims=True)     # (nb, 1)  lane reduce
            r = jnp.sum(r, axis=0, keepdims=True)         # (1, 1)   sublane reduce
            out_ref[0, k:k + 1, :] = jnp.broadcast_to(r, (1, 128))


def _pick_nb(n):
    """Batch rows per block: prefer sublane-full multiples of 8, capped at 32."""
    for k in (32, 24, 16, 8):
        if n % k == 0:
            return k
    if n <= 64:
        return n                     # full batch dim -> always a legal block dim
    best = 1
    for k in range(1, 65):
        if n % k == 0:
            best = k
    return best


def _pick_tp(p_pad, nb_pad, plane_elems):
    """Lane tile: multiple of 128 dividing p_pad, plane <= budget, prefer even #blocks."""
    max_tp = max(128, (plane_elems // nb_pad) // 128 * 128)
    cands = [d for d in range(128, p_pad + 1, 128) if p_pad % d == 0 and d <= max_tp]
    if not cands:
        cands = [128]
    even = [d for d in cands if (p_pad // d) % 2 == 0]   # enables dual-TC column split
    return max(even) if even else max(cands)


def loss_wrapper(pred, targets_onehot):
    """pred: (N, 2, H, W) float logits; targets_onehot: (N, 2, H, W) one-hot targets."""
    N, C, H, W = pred.shape
    assert C == 2, "Loss_wrapper uses a 2-class weight vector"
    P = H * W
    npix = float(N * P)

    # Pad the per-class pixel axis to a lane multiple (contribution removed below).
    P_pad = ((P + 127) // 128) * 128
    pad = P_pad - P
    pred_f = pred.reshape(N, C, P)
    tgt_f = targets_onehot.reshape(N, C, P)
    if pad:
        pred_f = jnp.pad(pred_f, ((0, 0), (0, 0), (0, pad)))
        tgt_f = jnp.pad(tgt_f, ((0, 0), (0, 0), (0, pad)))

    # Lane-dense 2-D layout: row n = [class-0 plane | class-1 plane]  (free reshape).
    pred_2d = pred_f.reshape(N, C * P_pad)
    tgt_2d = tgt_f.reshape(N, C * P_pad)

    # --- static tile selection -------------------------------------------------
    nb = _pick_nb(N)
    nb_pad = ((nb + 7) // 8) * 8
    tp = _pick_tp(P_pad, nb_pad, _PLANE_ELEMS)
    sb = N // nb                      # batch blocks
    jt = P_pad // tp                  # column blocks per class plane

    # Dual-TC (v7x) split: prefer splitting the column-block axis (works for any N);
    # fall back to batch blocks; else single slice (no-op on v5e/v6e either way).
    if jt % 2 == 0:
        nsplit, sbb, jc, split_cols = 2, sb, jt // 2, True
    elif sb % 2 == 0:
        nsplit, sbb, jc, split_cols = 2, sb // 2, jt, False
    else:
        nsplit, sbb, jc, split_cols = 1, sb, jt, True

    if split_cols:
        def _row(s, i): return i
        def _col(s, j): return s * jc + j
    else:
        def _row(s, i): return s * sbb + i
        def _col(s, j): return j

    grid = (nsplit, sbb, jc)

    parts = pl.pallas_call(
        _loss_kernel,
        out_shape=jax.ShapeDtypeStruct((nsplit, 4, 128), jnp.float32),
        grid_spec=pltpu.PrefetchScalarGridSpec(
            num_scalar_prefetch=0,
            grid=grid,
            in_specs=[
                # class-0 logits
                pl.BlockSpec((nb, tp), lambda s, i, j: (_row(s, i), _col(s, j))),
                # class-1 logits
                pl.BlockSpec((nb, tp), lambda s, i, j: (_row(s, i), jt + _col(s, j))),
                # class-1 target plane only (class 0 is redundant for one-hot targets)
                pl.BlockSpec((nb, tp), lambda s, i, j: (_row(s, i), jt + _col(s, j))),
            ],
            out_specs=pl.BlockSpec((1, 4, 128), lambda s, i, j: (s, 0, 0)),
            scratch_shapes=[pltpu.VMEM((4, nb, tp), jnp.float32)],
        ),
        compiler_params=pltpu.CompilerParams(
            dimension_semantics=("parallel", "arbitrary", "arbitrary"),
            vmem_limit_bytes=_VMEM_LIMIT_BYTES,
        ),
    )(pred_2d, pred_2d, tgt_2d)

    # Tiny epilogue: 4 scalars per slice (all lanes identical; take lane 0).
    sums = jnp.sum(parts[:, :, 0], axis=0)                  # (4,)
    s_wnll, s_cls1, s_inter, s_sig = sums[0], sums[1], sums[2], sums[3]

    if pad:
        # Remove exact contributions of zero-padded pixels (p0=p1=0, cls1=0):
        #   wnll += log(2); cls1 += 0; inter += 0.5; sig += 1.0   per padded pixel.
        n_pad = float(N * pad)
        s_wnll = s_wnll - n_pad * _LN2
        s_inter = s_inter - 0.5 * n_pad
        s_sig = s_sig - 1.0 * n_pad

    ce_den = npix + (CLASSWEIGHT - 1.0) * s_cls1            # Σ weights
    ce = s_wnll / ce_den
    dice = 1.0 - (2.0 * s_inter + SMOOTH) / (s_sig + npix + SMOOTH)
    return ce + dice


def loss_ref(pred, targets_onehot):
    """Pure-JAX reference mirroring the PyTorch Loss_wrapper forward."""
    t = jnp.argmax(targets_onehot, axis=1)                      # (N, H, W)
    logp = jax.nn.log_softmax(pred, axis=1)
    nll = -jnp.take_along_axis(logp, t[:, None], axis=1)[:, 0]  # (N, H, W)
    weight = jnp.array([1.0, CLASSWEIGHT], jnp.float32)
    w = weight[t]
    ce = jnp.sum(w * nll) / jnp.sum(w)
    sig = jax.nn.sigmoid(pred)
    onehot = jnp.moveaxis(jax.nn.one_hot(t, 2), -1, 1)          # (N, 2, H, W)
    inter = jnp.sum(sig * onehot)
    dice = 1.0 - (2.0 * inter + SMOOTH) / (jnp.sum(sig) + jnp.sum(onehot) + SMOOTH)
    return ce + dice


if __name__ == "__main__":
    key = jax.random.PRNGKey(0)
    k_pred, k_tgt = jax.random.split(key)

    N, C, H, W = 2, 2, 16, 16
    pred = jax.random.normal(k_pred, (N, C, H, W), dtype=jnp.float32)
    # one-hot targets over the channel dim (as the PyTorch module expects)
    tgt_idx = jax.random.randint(k_tgt, (N, H, W), 0, C)
    targets = jnp.moveaxis(jax.nn.one_hot(tgt_idx, C, dtype=jnp.float32), -1, 1)

    loss = jax.block_until_ready(loss_wrapper(pred, targets))
    ref = jax.block_until_ready(loss_ref(pred, targets))
    assert jnp.allclose(loss, ref, rtol=1e-5, atol=1e-5), (loss, ref)
    print("KERNEL_OK")
</pallas_src>

<mosaic_0001>
module attributes {stable_mosaic.version = 11 : i64} {
  func.func @_loss_kernel(%arg0: i32, %arg1: i32, %arg2: i32, %arg3: memref<2x128xf32, #tpu.memory_space<vmem>>, %arg4: memref<2x128xf32, #tpu.memory_space<vmem>>, %arg5: memref<2x128xf32, #tpu.memory_space<vmem>>, %arg6: memref<1x4x128xf32, #tpu.memory_space<vmem>>, %arg7: memref<4x2x128xf32, #tpu.memory_space<vmem>>) attributes {dimension_semantics = [#tpu.dimension_semantics<parallel>, #tpu.dimension_semantics<arbitrary>, #tpu.dimension_semantics<arbitrary>], iteration_bounds = array<i64: 2, 1, 1>, scalar_prefetch = 0 : i64, scratch_operands = 1 : i64, tpu.core_type = #tpu.core_type<tc>, window_params = [{transform_indices = @transform_0, window_bounds = array<i64: 2, 128>}, {transform_indices = @transform_1, window_bounds = array<i64: 2, 128>}, {transform_indices = @transform_2, window_bounds = array<i64: 2, 128>}, {transform_indices = @transform_3, window_bounds = array<i64: 1, 4, 128>}]} {
    %c0_i32 = arith.constant 0 : i32
    %0 = arith.cmpi eq, %arg1, %c0_i32 : i32
    %c0_i32_0 = arith.constant 0 : i32
    %1 = arith.cmpi eq, %arg2, %c0_i32_0 : i32
    %2 = arith.andi %0, %1 : i1
    %3 = arith.extui %2 : i1 to i32
    %c0_i32_1 = arith.constant 0 : i32
    %4 = arith.cmpi ne, %3, %c0_i32_1 : i32
    scf.if %4 {
      %cst_41 = arith.constant 0.000000e+00 : f32
      %73 = vector.broadcast %cst_41 : f32 to vector<4x2x128xf32>
      %c0_42 = arith.constant 0 : index
      %c0_43 = arith.constant 0 : index
      %c0_44 = arith.constant 0 : index
      %74 = vector.load %arg7[%c0_42, %c0_43, %c0_44] : memref<4x2x128xf32, #tpu.memory_space<vmem>>, vector<4x2x128xf32>
      tpu.vector_store %arg7[%c0_42, %c0_43, %c0_44], %73 {strides = array<i32>} : memref<4x2x128xf32, #tpu.memory_space<vmem>>, vector<4x2x128xf32>,
    } else {
    }
    %c0 = arith.constant 0 : index
    %c0_2 = arith.constant 0 : index
    %5 = vector.load %arg3[%c0, %c0_2] : memref<2x128xf32, #tpu.memory_space<vmem>>, vector<2x128xf32>
    %c0_3 = arith.constant 0 : index
    %c0_4 = arith.constant 0 : index
    %6 = vector.load %arg4[%c0_3, %c0_4] : memref<2x128xf32, #tpu.memory_space<vmem>>, vector<2x128xf32>
    %c0_5 = arith.constant 0 : index
    %c0_6 = arith.constant 0 : index
    %7 = vector.load %arg5[%c0_5, %c0_6] : memref<2x128xf32, #tpu.memory_space<vmem>>, vector<2x128xf32>
    %8 = arith.subf %6, %5 : vector<2x128xf32>
    %9 = math.absf %8 : vector<2x128xf32>
    %cst = arith.constant 0.000000e+00 : f32
    %10 = vector.broadcast %cst : f32 to vector<2x128xf32>
    %11 = arith.subf %10, %9 : vector<2x128xf32>
    %12 = math.exp %11 : vector<2x128xf32>
    %cst_7 = arith.constant 1.000000e+00 : f32
    %13 = vector.broadcast %cst_7 : f32 to vector<2x128xf32>
    %14 = arith.addf %13, %12 : vector<2x128xf32>
    %15 = math.log %14 : vector<2x128xf32>
    %cst_8 = arith.constant 0.000000e+00 : f32
    %16 = vector.broadcast %cst_8 : f32 to vector<2x128xf32>
    %17 = arith.maximumf %8, %16 : vector<2x128xf32>
    %18 = arith.mulf %7, %8 : vector<2x128xf32>
    %19 = arith.subf %17, %18 : vector<2x128xf32>
    %20 = arith.addf %19, %15 : vector<2x128xf32>
    %cst_9 = arith.constant 1.000000e+00 : f32
    %21 = vector.broadcast %cst_9 : f32 to vector<2x128xf32>
    %22 = arith.mulf %21, %7 : vector<2x128xf32>
    %cst_10 = arith.constant 1.000000e+00 : f32
    %23 = vector.broadcast %cst_10 : f32 to vector<2x128xf32>
    %24 = arith.addf %23, %22 : vector<2x128xf32>
    %cst_11 = arith.constant 5.000000e-01 : f32
    %25 = vector.broadcast %cst_11 : f32 to vector<2x128xf32>
    %26 = arith.mulf %25, %5 : vector<2x128xf32>
    %27 = math.tanh %26 : vector<2x128xf32>
    %cst_12 = arith.constant 5.000000e-01 : f32
    %28 = vector.broadcast %cst_12 : f32 to vector<2x128xf32>
    %29 = arith.mulf %28, %27 : vector<2x128xf32>
    %cst_13 = arith.constant 5.000000e-01 : f32
    %30 = vector.broadcast %cst_13 : f32 to vector<2x128xf32>
    %31 = arith.addf %29, %30 : vector<2x128xf32>
    %cst_14 = arith.constant 5.000000e-01 : f32
    %32 = vector.broadcast %cst_14 : f32 to vector<2x128xf32>
    %33 = arith.mulf %32, %6 : vector<2x128xf32>
    %34 = math.tanh %33 : vector<2x128xf32>
    %cst_15 = arith.constant 5.000000e-01 : f32
    %35 = vector.broadcast %cst_15 : f32 to vector<2x128xf32>
    %36 = arith.mulf %35, %34 : vector<2x128xf32>
    %cst_16 = arith.constant 5.000000e-01 : f32
    %37 = vector.broadcast %cst_16 : f32 to vector<2x128xf32>
    %38 = arith.addf %36, %37 : vector<2x128xf32>
    %c0_17 = arith.constant 0 : index
    %c0_18 = arith.constant 0 : index
    %c0_19 = arith.constant 0 : index
    %39 = vector.load %arg7[%c0_17, %c0_18, %c0_19] : memref<4x2x128xf32, #tpu.memory_space<vmem>>, vector<1x2x128xf32>
    %40 = vector.shape_cast %39 : vector<1x2x128xf32> to vector<2x128xf32>
    %41 = arith.mulf %24, %20 : vector<2x128xf32>
    %42 = arith.addf %40, %41 : vector<2x128xf32>
    %c0_20 = arith.constant 0 : index
    %c0_21 = arith.constant 0 : index
    %c0_22 = arith.constant 0 : index
    %43 = vector.load %arg7[%c0_20, %c0_21, %c0_22] : memref<4x2x128xf32, #tpu.memory_space<vmem>>, vector<1x2x128xf32>
    %44 = vector.shape_cast %43 : vector<1x2x128xf32> to vector<2x128xf32>
    %45 = vector.shape_cast %42 : vector<2x128xf32> to vector<1x2x128xf32>
    tpu.vector_store %arg7[%c0_20, %c0_21, %c0_22], %45 {strides = array<i32>} : memref<4x2x128xf32, #tpu.memory_space<vmem>>, vector<1x2x128xf32>,
    %c1 = arith.constant 1 : index
    %c0_23 = arith.constant 0 : index
    %c0_24 = arith.constant 0 : index
    %46 = vector.load %arg7[%c1, %c0_23, %c0_24] : memref<4x2x128xf32, #tpu.memory_space<vmem>>, vector<1x2x128xf32>
    %47 = vector.shape_cast %46 : vector<1x2x128xf32> to vector<2x128xf32>
    %48 = arith.addf %47, %7 : vector<2x128xf32>
    %c1_25 = arith.constant 1 : index
    %c0_26 = arith.constant 0 : index
    %c0_27 = arith.constant 0 : index
    %49 = vector.load %arg7[%c1_25, %c0_26, %c0_27] : memref<4x2x128xf32, #tpu.memory_space<vmem>>, vector<1x2x128xf32>
    %50 = vector.shape_cast %49 : vector<1x2x128xf32> to vector<2x128xf32>
    %51 = vector.shape_cast %48 : vector<2x128xf32> to vector<1x2x128xf32>
    tpu.vector_store %arg7[%c1_25, %c0_26, %c0_27], %51 {strides = array<i32>} : memref<4x2x128xf32, #tpu.memory_space<vmem>>, vector<1x2x128xf32>,
    %c2 = arith.constant 2 : index
    %c0_28 = arith.constant 0 : index
    %c0_29 = arith.constant 0 : index
    %52 = vector.load %arg7[%c2, %c0_28, %c0_29] : memref<4x2x128xf32, #tpu.memory_space<vmem>>, vector<1x2x128xf32>
    %53 = vector.shape_cast %52 : vector<1x2x128xf32> to vector<2x128xf32>
    %54 = arith.subf %38, %31 : vector<2x128xf32>
    %55 = arith.mulf %7, %54 : vector<2x128xf32>
    %56 = arith.addf %31, %55 : vector<2x128xf32>
    %57 = arith.addf %53, %56 : vector<2x128xf32>
    %c2_30 = arith.constant 2 : index
    %c0_31 = arith.constant 0 : index
    %c0_32 = arith.constant 0 : index
    %58 = vector.load %arg7[%c2_30, %c0_31, %c0_32] : memref<4x2x128xf32, #tpu.memory_space<vmem>>, vector<1x2x128xf32>
    %59 = vector.shape_cast %58 : vector<1x2x128xf32> to vector<2x128xf32>
    %60 = vector.shape_cast %57 : vector<2x128xf32> to vector<1x2x128xf32>
    tpu.vector_store %arg7[%c2_30, %c0_31, %c0_32], %60 {strides = array<i32>} : memref<4x2x128xf32, #tpu.memory_space<vmem>>, vector<1x2x128xf32>,
    %c3 = arith.constant 3 : index
    %c0_33 = arith.constant 0 : index
    %c0_34 = arith.constant 0 : index
    %61 = vector.load %arg7[%c3, %c0_33, %c0_34] : memref<4x2x128xf32, #tpu.memory_space<vmem>>, vector<1x2x128xf32>
    %62 = vector.shape_cast %61 : vector<1x2x128xf32> to vector<2x128xf32>
    %63 = arith.addf %31, %38 : vector<2x128xf32>
    %64 = arith.addf %62, %63 : vector<2x128xf32>
    %c3_35 = arith.constant 3 : index
    %c0_36 = arith.constant 0 : index
    %c0_37 = arith.constant 0 : index
    %65 = vector.load %arg7[%c3_35, %c0_36, %c0_37] : memref<4x2x128xf32, #tpu.memory_space<vmem>>, vector<1x2x128xf32>
    %66 = vector.shape_cast %65 : vector<1x2x128xf32> to vector<2x128xf32>
    %67 = vector.shape_cast %64 : vector<2x128xf32> to vector<1x2x128xf32>
    tpu.vector_store %arg7[%c3_35, %c0_36, %c0_37], %67 {strides = array<i32>} : memref<4x2x128xf32, #tpu.memory_space<vmem>>, vector<1x2x128xf32>,
    %c0_i32_38 = arith.constant 0 : i32
    %68 = arith.cmpi eq, %arg1, %c0_i32_38 : i32
    %c0_i32_39 = arith.constant 0 : i32
    %69 = arith.cmpi eq, %arg2, %c0_i32_39 : i32
    %70 = arith.andi %68, %69 : i1
    %71 = arith.extui %70 : i1 to i32
    %c0_i32_40 = arith.constant 0 : i32
    %72 = arith.cmpi ne, %71, %c0_i32_40 : i32
    scf.if %72 {
      %c0_41 = arith.constant 0 : index
      %c0_42 = arith.constant 0 : index
      %c0_43 = arith.constant 0 : index
      %73 = vector.load %arg7[%c0_41, %c0_42, %c0_43] : memref<4x2x128xf32, #tpu.memory_space<vmem>>, vector<1x2x128xf32>
      %74 = vector.shape_cast %73 : vector<1x2x128xf32> to vector<2x128xf32>
      %cst_44 = arith.constant dense<0.000000e+00> : vector<2xf32>
      %75 = vector.multi_reduction <add>, %74, %cst_44 [1] : vector<2x128xf32> to vector<2xf32>
      %76 = vector.shape_cast %75 : vector<2xf32> to vector<2x1xf32>
      %cst_45 = arith.constant dense<0.000000e+00> : vector<1xf32>
      %77 = vector.multi_reduction <add>, %76, %cst_45 [0] : vector<2x1xf32> to vector<1xf32>
      %78 = vector.shape_cast %77 : vector<1xf32> to vector<1x1xf32>
      %79 = vector.shape_cast %78 : vector<1x1xf32> to vector<1x1xf32>
      %80 = vector.broadcast %79 : vector<1x1xf32> to vector<1x128xf32>
      %c0_46 = arith.constant 0 : index
      %c0_47 = arith.constant 0 : index
      %c0_48 = arith.constant 0 : index
      %81 = vector.load %arg6[%c0_46, %c0_47, %c0_48] : memref<1x4x128xf32, #tpu.memory_space<vmem>>, vector<1x1x128xf32>
      %82 = vector.shape_cast %81 : vector<1x1x128xf32> to vector<1x128xf32>
      %83 = vector.shape_cast %80 : vector<1x128xf32> to vector<1x1x128xf32>
      tpu.vector_store %arg6[%c0_46, %c0_47, %c0_48], %83 {strides = array<i32>} : memref<1x4x128xf32, #tpu.memory_space<vmem>>, vector<1x1x128xf32>,
      %c1_49 = arith.constant 1 : index
      %c0_50 = arith.constant 0 : index
      %c0_51 = arith.constant 0 : index
      %84 = vector.load %arg7[%c1_49, %c0_50, %c0_51] : memref<4x2x128xf32, #tpu.memory_space<vmem>>, vector<1x2x128xf32>
      %85 = vector.shape_cast %84 : vector<1x2x128xf32> to vector<2x128xf32>
      %cst_52 = arith.constant dense<0.000000e+00> : vector<2xf32>
      %86 = vector.multi_reduction <add>, %85, %cst_52 [1] : vector<2x128xf32> to vector<2xf32>
      %87 = vector.shape_cast %86 : vector<2xf32> to vector<2x1xf32>
      %cst_53 = arith.constant dense<0.000000e+00> : vector<1xf32>
      %88 = vector.multi_reduction <add>, %87, %cst_53 [0] : vector<2x1xf32> to vector<1xf32>
      %89 = vector.shape_cast %88 : vector<1xf32> to vector<1x1xf32>
      %90 = vector.shape_cast %89 : vector<1x1xf32> to vector<1x1xf32>
      %91 = vector.broadcast %90 : vector<1x1xf32> to vector<1x128xf32>
      %c0_54 = arith.constant 0 : index
      %c1_55 = arith.constant 1 : index
      %c0_56 = arith.constant 0 : index
      %92 = vector.load %arg6[%c0_54, %c1_55, %c0_56] : memref<1x4x128xf32, #tpu.memory_space<vmem>>, vector<1x1x128xf32>
      %93 = vector.shape_cast %92 : vector<1x1x128xf32> to vector<1x128xf32>
      %94 = vector.shape_cast %91 : vector<1x128xf32> to vector<1x1x128xf32>
      tpu.vector_store %arg6[%c0_54, %c1_55, %c0_56], %94 {strides = array<i32>} : memref<1x4x128xf32, #tpu.memory_space<vmem>>, vector<1x1x128xf32>,
      %c2_57 = arith.constant 2 : index
      %c0_58 = arith.constant 0 : index
      %c0_59 = arith.constant 0 : index
      %95 = vector.load %arg7[%c2_57, %c0_58, %c0_59] : memref<4x2x128xf32, #tpu.memory_space<vmem>>, vector<1x2x128xf32>
      %96 = vector.shape_cast %95 : vector<1x2x128xf32> to vector<2x128xf32>
      %cst_60 = arith.constant dense<0.000000e+00> : vector<2xf32>
      %97 = vector.multi_reduction <add>, %96, %cst_60 [1] : vector<2x128xf32> to vector<2xf32>
      %98 = vector.shape_cast %97 : vector<2xf32> to vector<2x1xf32>
      %cst_61 = arith.constant dense<0.000000e+00> : vector<1xf32>
      %99 = vector.multi_reduction <add>, %98, %cst_61 [0] : vector<2x1xf32> to vector<1xf32>
      %100 = vector.shape_cast %99 : vector<1xf32> to vector<1x1xf32>
      %101 = vector.shape_cast %100 : vector<1x1xf32> to vector<1x1xf32>
      %102 = vector.broadcast %101 : vector<1x1xf32> to vector<1x128xf32>
      %c0_62 = arith.constant 0 : index
      %c2_63 = arith.constant 2 : index
      %c0_64 = arith.constant 0 : index
      %103 = vector.load %arg6[%c0_62, %c2_63, %c0_64] : memref<1x4x128xf32, #tpu.memory_space<vmem>>, vector<1x1x128xf32>
      %104 = vector.shape_cast %103 : vector<1x1x128xf32> to vector<1x128xf32>
      %105 = vector.shape_cast %102 : vector<1x128xf32> to vector<1x1x128xf32>
      tpu.vector_store %arg6[%c0_62, %c2_63, %c0_64], %105 {strides = array<i32>} : memref<1x4x128xf32, #tpu.memory_space<vmem>>, vector<1x1x128xf32>,
      %c3_65 = arith.constant 3 : index
      %c0_66 = arith.constant 0 : index
      %c0_67 = arith.constant 0 : index
      %106 = vector.load %arg7[%c3_65, %c0_66, %c0_67] : memref<4x2x128xf32, #tpu.memory_space<vmem>>, vector<1x2x128xf32>
      %107 = vector.shape_cast %106 : vector<1x2x128xf32> to vector<2x128xf32>
      %cst_68 = arith.constant dense<0.000000e+00> : vector<2xf32>
      %108 = vector.multi_reduction <add>, %107, %cst_68 [1] : vector<2x128xf32> to vector<2xf32>
      %109 = vector.shape_cast %108 : vector<2xf32> to vector<2x1xf32>
      %cst_69 = arith.constant dense<0.000000e+00> : vector<1xf32>
      %110 = vector.multi_reduction <add>, %109, %cst_69 [0] : vector<2x1xf32> to vector<1xf32>
      %111 = vector.shape_cast %110 : vector<1xf32> to vector<1x1xf32>
      %112 = vector.shape_cast %111 : vector<1x1xf32> to vector<1x1xf32>
      %113 = vector.broadcast %112 : vector<1x1xf32> to vector<1x128xf32>
      %c0_70 = arith.constant 0 : index
      %c3_71 = arith.constant 3 : index
      %c0_72 = arith.constant 0 : index
      %114 = vector.load %arg6[%c0_70, %c3_71, %c0_72] : memref<1x4x128xf32, #tpu.memory_space<vmem>>, vector<1x1x128xf32>
      %115 = vector.shape_cast %114 : vector<1x1x128xf32> to vector<1x128xf32>
      %116 = vector.shape_cast %113 : vector<1x128xf32> to vector<1x1x128xf32>
      tpu.vector_store %arg6[%c0_70, %c3_71, %c0_72], %116 {strides = array<i32>} : memref<1x4x128xf32, #tpu.memory_space<vmem>>, vector<1x1x128xf32>,
    } else {
    }
    return
  }
  func.func @transform_0(%arg0: i32, %arg1: i32, %arg2: i32) -> (i32, i32) {
    %c1_i32 = arith.constant 1 : i32
    %0 = arith.muli %arg0, %c1_i32 : i32
    %1 = arith.addi %0, %arg2 : i32
    %c0_i32 = arith.constant 0 : i32
    return %arg1, %1 : i32, i32
  }
  func.func @transform_1(%arg0: i32, %arg1: i32, %arg2: i32) -> (i32, i32) {
    %c1_i32 = arith.constant 1 : i32
    %0 = arith.muli %arg0, %c1_i32 : i32
    %1 = arith.addi %0, %arg2 : i32
    %c2_i32 = arith.constant 2 : i32
    %2 = arith.addi %c2_i32, %1 : i32
    %c0_i32 = arith.constant 0 : i32
    return %arg1, %2 : i32, i32
  }
  func.func @transform_2(%arg0: i32, %arg1: i32, %arg2: i32) -> (i32, i32) {
    %c1_i32 = arith.constant 1 : i32
    %0 = arith.muli %arg0, %c1_i32 : i32
    %1 = arith.addi %0, %arg2 : i32
    %c2_i32 = arith.constant 2 : i32
    %2 = arith.addi %c2_i32, %1 : i32
    %c0_i32 = arith.constant 0 : i32
    return %arg1, %2 : i32, i32
  }
  func.func @transform_3(%arg0: i32, %arg1: i32, %arg2: i32) -> (i32, i32, i32) {
    %c0_i32 = arith.constant 0 : i32
    %c0_i32_0 = arith.constant 0 : i32
    %c0_i32_1 = arith.constant 0 : i32
    return %arg0, %c0_i32, %c0_i32_0 : i32, i32, i32
  }
}

</mosaic_0001>

<bundles_post_ra>
// kernel: tpu_custom_call.1
= control target key start
LH: loop header
LB: loop body
LE: loop exit
PB: predicated region body
PF: predicated region fallthrough
CT: control target
= control target key end

     0   :  { %s1240_s0 = inlined_call_operand.hbm [shape: f32[2,512], index: 0, kind: input, shape index: {}]   ;;  %s1241_s1 = inlined_call_operand.hbm [shape: f32[2,512], index: 1, kind: input, shape index: {}]   ;;  %s1242_s2 = inlined_call_operand.hbm [shape: f32[2,512], index: 2, kind: input, shape index: {}]   ;;  %s1243_s3 = inlined_call_operand.hbm [shape: f32[2,4,128], index: 3, kind: output, shape index: {}]  }
   0x1   :  { %1257 = sst [smem:[#allocation20_spill]] %s1241_s1 }
   0x2   :  { %8 = vsyncpa [#allocation4], 0 }
   0x3   :  { %10 = vsyncpa [#allocation4 + $0x1], 0 }
   0x4   :  { %11 = vsyncpa [#allocation7], 0 }
   0x5   :  { %13 = vsyncpa [#allocation7 + $0x1], 0 }
   0x6   :  { %14 = vsyncpa [#allocation5], 0 }
   0x7   :  { %16 = vsyncpa [#allocation5 + $0x1], 0  ;;  %s915_s12 = smov 0   ;;  %s917_s13 = smov 0  }
   0x8   :  { %s919_s14 = smov 0   ;;  %s921_s15 = smov 0  }
   0x9   :  { %s923_s16 = smov 0   ;;  %s925_s17 = smov 0  }
   0xa   :  { %s927_s18 = smov 0   ;;  %s929_s19 = smov 0  }
   0xb   :  { %s931_s20 = smov 0  }
   0xc LB: > { %1258 = sst [smem:[#allocation13_spill]] %s864_s14  ;;  %s959_s21 = sadd.s32 4294967295, %s888_s20   ;;  %s888_s20 = sphi %s931_s20, %s22_s20   ;;  %s884_s19 = sphi %s929_s19, %s1293_s19   ;;  %s880_s18 = sphi %s927_s18, %s1292_s18   ;;  %s876_s17 = sphi %s925_s17, %s1291_s17   ;;  %s872_s16 = sphi %s923_s16, %s1297_s16   ;;  %s868_s15 = sphi %s921_s15, %s1296_s15   ;;  %s864_s14 = sphi %s919_s14, %s1289_s14   ;;  %s860_s13 = sphi %s917_s13, %s1295_s13   ;;  %s856_s12 = sphi %s915_s12, %s1294_s12  }
   0xd   : > { %1259 = sst [smem:[#allocation14_spill]] %s876_s17  ;;  %s41_s22 = sadd.s32 1, %s884_s19 }
   0xe   : > { %1260 = sst [smem:[#allocation15_spill]] %s884_s19  ;;  %p43_p0 = scmp.ge.s32.totalorder %s41_s22, 2 }
   0xf   : > { %1261 = sst [smem:[#allocation16_spill]] %s888_s20  ;;  %p1246_p1 = scmp.eq.s32.totalorder %s888_s20, 0 }
  0x10   : > { %p1245_p2 = scmp.eq.s32.totalorder %s959_s21, 0  ;;  %s76_s23 = sadd.s32 2, %s884_s19 }
  0x11   : > { %s1299_s22 = smov (%p43_p0, %s41_s22), 0  ;;  %s84_s24 = sadd.s32 1, %s864_s14 }
  0x12   : > { %1262 = sst [smem:[#allocation17_spill]] %s1299_s22  ;;  %p91_p3 = scmp.ne.s32.totalorder %s864_s14, %s860_s13 }
  0x13   : > { %s48_s25 = ssub.s32 %s884_s19, %s1299_s22  ;;  %s78_s26 = sadd.s32 2, %s1299_s22 }
  0x14   : > { %p973_p4 = scmp.eq.s32.totalorder %s48_s25, 0  ;;  %s80_s28 = ssub.s32 %s76_s23, %s78_s26 }
  0x15   : > { %p82_p5 = scmp.eq.s32.totalorder %s80_s28, 0  ;;  %p979_p6 = por %p91_p3, %p1246_p1 }
  0x16   : > { %p97_p7 = scmp.ne.s32.totalorder %s860_s13, %s856_s12  ;;  %p1244_p10 = scmp.lt.s32.totalorder %s888_s20, 2 }
  0x17   : > { %s986_s30 = scalar_select %p82_p5, %s864_s14, %s84_s24  }
  0x18   : > { %p990_p9 = por %p97_p7, %p1245_p2  ;;  %s996_s5 = sshll.u32 %s884_s19, 5 }
  0x19   : > { %1265 = sst [smem:[#allocation18_spill]] %s986_s30  ;;  %s200_s6 = sand.u32 1, %s888_s20  }
  0x1a   : > { %s1266_s4 = scalar_select %p990_p9, 1, 0 }
  0x1b   : > { %s202_s7 = sand.u32 1, %s864_s14   ;;  %s1267_s1 = sld [smem:[#allocation20_spill]] }
  0x1c   : > { %s1000_s8 = sshll.u32 %s202_s7, 1  ;;  %p1013_p11 = pnand %p1244_p10, %p979_p6 }
  0x1d   : > { %s204_s23 = scalar_lea.vmem [#allocation6], %s1000_s8  ;;  %s1020_s26 = scalar_lea.sflag [#allocation7], %s200_s6 }
  0x1e   : > { %s215_s24 = sshll.u32 %s204_s23, 4  ;;  %p1254_p0 = pneg %p1013_p11  ;;  %s1017_s24 = int_to_ptr.vmem [resolvable:$true] %s215_s24 }
  0x21   : > { %s469_s11 = scalar_lea.hbm %s1267_s1, %s996_s5  ;;  %s691_s9 = scalar_lea.hbm %s1267_s1, 128 }
  0x22   : > { %s1006_s12 = scalar_lea.hbm %s469_s11, 64  ;;  %s716_s28 = scalar_lea.hbm %s469_s11, 96 }
  0x23   : > { %p687_p13 = scmp.ne.s32.totalorder %s1006_s12, %s716_s28  ;;  %p692_p6 = scmp.lt.u32.totalorder %s1006_s12, %s1267_s1 }
  0x24   : > { %p693_p7 = scmp.lt.u32.totalorder %s691_s9, %s716_s28  ;;  %p695_p10 = scmp.lt.u32.totalorder %s716_s28, %s1006_s12 }
  0x25   : > { %p689_p3 = pnand %p1254_p0, %p687_p13 }
  0x26   : > { %p694_p8 = por %p693_p7, %p692_p6 }
  0x27   : > { %p690_p5 = pneg %p689_p3 }
  0x28   : > { %p696_p2 = por %p695_p10, %p694_p8 }
  0x2a   : > { %p697_p1 = pnand %p696_p2, %p690_p5 }
  0x2c   : > { %700 = shalt.err (!%p697_p1)
}
  0x2d   : > { %s701_s6 = scalar_lea.vmem %s1017_s24, 32  ;;  %s890_s11 = smov [#allocation6]  }
  0x2e   : > { %p702_p13 = scmp.ne.s32.totalorder %s1017_s24, %s701_s6  ;;  %s706_s29 = sshll.u32 %s890_s11, 4  ;;  %s707_s29 = int_to_ptr.vmem [resolvable:$false] %s706_s29 }
  0x2f   : > { %s708_s7 = scalar_lea.vmem %s707_s29, 64  ;;  %p709_p9 = scmp.lt.s32.totalorder %s1017_s24, %s707_s29 }
  0x30   : > { %p704_p3 = pnand %p702_p13, %p1254_p0  ;;  %p710_p6 = scmp.lt.s32.totalorder %s708_s7, %s701_s6 }
  0x32   : > { %p705_p12 = pneg %p704_p3  ;;  %p711_p7 = por %p710_p6, %p709_p9 }
  0x34   : > { %p712_p8 = pnand %p711_p7, %p705_p12 }
  0x36   : > { %715 = shalt.err (!%p712_p8)
}
  0x37   : > { %595 = dma.hbm_to_vmem [thread:$0]  (!%p1013_p11), %s1006_s12, 32, %s1017_s24, %s1020_s26  }
  0x38   : > { %p242_p1 = scmp.lt.s32.totalorder %s888_s20, 3  ;;  %p1269_p2 = scmp.ge.s32.totalorder %s888_s20, 1 }
  0x39   : > { %s563_s9 = sadd.s32 4294967294, %s888_s20   ;;  %s52_s10 = sadd.s32 1, %s876_s17 }
  0x3a   : > { %p1050_p9 = pnand %p1269_p2, %p242_p1  ;;  %p59_p10 = scmp.ne.s32.totalorder %s876_s17, %s872_s16 }
  0x3b   : > { %s1059_s23 = scalar_select %p973_p4, %s876_s17, %s52_s10  }
  0x3c   : > { %s1270_s28 = scalar_select %p1050_p9, 1, 0 }
  0x3d   : > { %1271 = sst [smem:[#allocation19_spill]] %s1059_s23  ;;  %p65_p12 = scmp.ne.s32.totalorder %s872_s16, %s868_s15 }
  0x3e   : > { %p153_p5 = scmp.eq.s32.totalorder %s959_s21, 1  ;;  %p159_p13 = scmp.eq.s32.totalorder %s563_s9, 1 }
  0x3f   : > { %p1272_p3 = scmp.eq.s32.totalorder %s888_s20, 0  ;;  %p1273_p7 = scmp.eq.s32.totalorder %s959_s21, 0 }
  0x40   : > { %p1074_p1 = por %p153_p5, %p59_p10  ;;  %p1078_p2 = por %p159_p13, %p65_p12 }
  0x41   : > { %p61_p6 = por %p1272_p3, %p59_p10  ;;  %p1070_p8 = por %p1273_p7, %p65_p12 }
  0x42   : > { %s1275_s24 = scalar_select %p1074_p1, 1, 0 }
  0x43   : > { %s1274_s12 = scalar_select %p1070_p8, 1, 0 }
  0x44   : > { %s1276_s27 = scalar_select %p1078_p2, 1, 0 }
  0x45   : > { %s179_s6 = sand.u32 1, %s876_s17   ;;  %s1087_s7 = scalar_lea.hbm %s1240_s0, %s996_s5 }
  0x46   : > { %s566_s9 = sshll.u32 %s179_s6, 1  ;;  %p1277_p4 = scmp.lt.s32.totalorder %s888_s20, 2 }
  0x47   : > { %s183_s1 = scalar_lea.vmem [#allocation3], %s566_s9  ;;  %s1099_s11 = scalar_lea.hbm %s1242_s2, %s996_s5 }
  0x48   : > { %p1091_p10 = pnand %p1277_p4, %p61_p6  ;;  %s193_s22 = sshll.u32 %s183_s1, 4  ;;  %s1101_s22 = int_to_ptr.vmem [resolvable:$true] %s193_s22 }
  0x49   : > { %s180_s29 = scalar_lea.sflag [#allocation4], %s179_s6  ;;  %s717_s17 = scalar_lea.hbm %s1087_s7, 32 }
  0x4a   : > { %p718_p12 = scmp.ne.s32.totalorder %s1087_s7, %s717_s17  ;;  %p719_p5 = pneg %p1091_p10 }
  0x4b   : > { %s722_s1 = scalar_lea.hbm %s1240_s0, 128  ;;  %p723_p6 = scmp.lt.u32.totalorder %s1087_s7, %s1240_s0 }
  0x4c   : > { %p720_p13 = pnand %p719_p5, %p718_p12  ;;  %p724_p7 = scmp.lt.u32.totalorder %s722_s1, %s717_s17 }
  0x4d   : > { %p726_p0 = scmp.lt.u32.totalorder %s717_s17, %s1087_s7 }
  0x4e   : > { %p721_p3 = pneg %p720_p13  ;;  %p725_p4 = por %p724_p7, %p723_p6 }
  0x50   : > { %p727_p2 = por %p726_p0, %p725_p4 }
  0x52   : > { %p728_p1 = pnand %p727_p2, %p721_p3 }
  0x54   : > { %731 = shalt.err (!%p728_p1)
}
  0x55   : > { %s732_s19 = scalar_lea.vmem %s1101_s22, 32  ;;  %s891_s14 = smov [#allocation3]  }
  0x56   : > { %p733_p12 = scmp.ne.s32.totalorder %s1101_s22, %s732_s19  ;;  %s737_s30 = sshll.u32 %s891_s14, 4  ;;  %s738_s30 = int_to_ptr.vmem [resolvable:$false] %s737_s30 }
  0x57   : > { %s739_s20 = scalar_lea.vmem %s738_s30, 64  ;;  %p740_p9 = scmp.lt.s32.totalorder %s1101_s22, %s738_s30 }
  0x58   : > { %p735_p13 = pnand %p733_p12, %p719_p5  ;;  %p741_p6 = scmp.lt.s32.totalorder %s739_s20, %s732_s19 }
  0x5a   : > { %p736_p8 = pneg %p735_p13  ;;  %p742_p7 = por %p741_p6, %p740_p9 }
  0x5c   : > { %p743_p0 = pnand %p742_p7, %p736_p8 }
  0x5e   : > { %746 = shalt.err (!%p743_p0)
}
  0x5f   : > { %592 = dma.hbm_to_vmem [thread:$0]  (!%p1091_p10), %s1087_s7, 32, %s1101_s22, %s180_s29  }
  0x60   : > { %s1129_s17 = scalar_lea.hbm %s1099_s11, 64  ;;  %s226_s5 = scalar_lea.vmem [#allocation8], %s1000_s8 }
  0x61   : > { %s237_s23 = sshll.u32 %s226_s5, 4  ;;  %s777_s6 = scalar_lea.hbm %s1099_s11, 96  ;;  %s238_s23 = int_to_ptr.vmem [resolvable:$true] %s237_s23 }
  0x62   : > { %p748_p9 = scmp.ne.s32.totalorder %s1129_s17, %s777_s6  ;;  %p1279_p8 = pneg %p1013_p11 }
  0x63   : > { %s752_s9 = scalar_lea.hbm %s1242_s2, 128  ;;  %p753_p10 = scmp.lt.u32.totalorder %s1129_s17, %s1242_s2 }
  0x64   : > { %p750_p1 = pnand %p748_p9, %p1279_p8  ;;  %p754_p5 = scmp.lt.u32.totalorder %s752_s9, %s777_s6 }
  0x65   : > { %p756_p4 = scmp.lt.u32.totalorder %s777_s6, %s1129_s17 }
  0x66   : > { %p751_p2 = pneg %p750_p1  ;;  %p755_p3 = por %p754_p5, %p753_p10 }
  0x68   : > { %p757_p12 = por %p756_p4, %p755_p3 }
  0x6a   : > { %p758_p13 = pnand %p757_p12, %p751_p2 }
  0x6c   : > { %761 = shalt.err (!%p758_p13)
}
  0x6d   : > { %s762_s8 = scalar_lea.vmem %s238_s23, 32  ;;  %p1280_p7 = pmov %p1279_p8 }
  0x6e   : > { %p763_p6 = scmp.ne.s32.totalorder %s238_s23, %s762_s8  ;;  %s892_s7 = smov [#allocation8]  }
  0x6f   : > { %s767_s11 = sshll.u32 %s892_s7, 4  ;;  %s768_s11 = int_to_ptr.vmem [resolvable:$false] %s767_s11 }
  0x70   : > { %p765_p0 = pnand %p763_p6, %p1280_p7  ;;  %s769_s29 = scalar_lea.vmem %s768_s11, 64 }
  0x71   : > { %p770_p8 = scmp.lt.s32.totalorder %s238_s23, %s768_s11  ;;  %p771_p1 = scmp.lt.s32.totalorder %s769_s29, %s762_s8 }
  0x72   : > { %p766_p9 = pneg %p765_p0 }
  0x73   : > { %p772_p5 = por %p771_p1, %p770_p8 }
  0x75   : > { %p773_p10 = pnand %p772_p5, %p766_p9 }
  0x77   : > { %776 = shalt.err (!%p773_p10)
}
  0x78   : > { %598 = dma.hbm_to_vmem [thread:$0]  (!%p1013_p11), %s1129_s17, 32, %s238_s23, %s1020_s26  }
  0x79   : > { %p1281_p2 = scmp.ne.s32.totalorder %s1270_s28, 0 }
  0x7a   : > { %s1155_s14 = sand.u32 (!%p1281_p2), 1, %s872_s16   ;;  %p1282_p3 = scmp.ne.s32.totalorder (!%p1281_p2), %s1274_s12, 0 }
  0x7b   : > { %246 = sbr.rel (%p1281_p2) target bundleno = 359 (0x167), region = 32  ;;  %s573_s30 = sshll.u32 (!%p1281_p2), %s1155_s14, 1 }
  0x7c   : > { %s249_s20 = scalar_lea.sflag (!%p1281_p2), [#allocation4], %s1155_s14  ;;  %s252_s5 = scalar_lea.vmem (!%p1281_p2), [#allocation3], %s573_s30 }
  0x82   : > { %843 = dma.done.wait (%p1282_p3), %s249_s20, 32  }
  0x83   : > { %845 = vsyncadd (%p1282_p3), %s249_s20, 4294967264  ;;  %s257_s25 = sand.u32 1, %s959_s21   ;;  %s259_s26 = sand.u32 1, %s860_s13  }
  0x84   : > { %s574_s28 = sshll.u32 %s259_s26, 1  ;;  %s258_s17 = scalar_lea.sflag [#allocation7], %s257_s25 }
  0x85   : > { %s261_s23 = scalar_lea.vmem [#allocation6], %s574_s28  ;;  %p1283_p11 = scmp.ne.s32.totalorder %s1266_s4, 0 }
  0x87   : > { %847 = dma.done.wait (%p1283_p11), %s258_s17, 64  }
  0x88   : > { %849 = vsyncadd (%p1283_p11), %s258_s17, 4294967232  ;;  %v893_v0 = vmov 0.0   ;;  %v318_v1 = vld [vmem:[%s252_s5] sm:$0x3]  ;;  %v319_v2 = vld [vmem:[%s261_s23] sm:$0x3] }
  0x89   : > { %316 = vst [vmem:[#allocation2 + $0x4] sm:$0x3] %v893_v0  ;;  %314 = vst [vmem:[#allocation2] sm:$0x3] %v893_v0  ;;  %v321_v3 = vsub.f32 %v319_v2, %v318_v1  ;;  %v334_v4 = vmul.f32 0.5, %v318_v1  ;;  %v338_v5 = vmul.f32 0.5, %v319_v2 }
  0x8a   : > { %315 = vst [vmem:[#allocation2 + $0x2] sm:$0x3] %v893_v0  ;;  %317 = vst [vmem:[#allocation2 + $0x6] sm:$0x3] %v893_v0  ;;  %s270_s21 = scalar_lea.vmem [#allocation8], %s574_s28  ;;  %vm365_vm0 = vcmask 1041408  }
  0x8b   : > { %v320_v7 = vld [vmem:[%s270_s21] sm:$0x3]  ;;  %678 = vtanh.f32 %v334_v4  ;;  %v322_v8 = vand.u32 2147483647, %v321_v3  ;;  %v329_v28 = vmax.f32 %v321_v3, 0.0  ;;  %s576_s4 = sshll.u32 %s1155_s14, 2 }
  0x8c   : > { %680 = vtanh.f32 %v338_v5  ;;  %v330_v29 = vmul.f32 %v321_v3, %v320_v7  ;;  %v333_v33 = vadd.f32 1.0, %v320_v7  ;;  %s302_s12 = scalar_lea.vmem [#allocation9], %s576_s4  ;;  %s578_s6 = sshll.u32 %s880_s18, 6 }
  0x8d   : > { %v323_v10 = vsub.f32 0.0, %v322_v8  ;;  %s427_s10 = sshll.u32 %s302_s12, 4  ;;  %s1182_s19 = scalar_lea.hbm %s1243_s3, %s578_s6  ;;  %s1184_s10 = int_to_ptr.vmem [resolvable:$true] %s427_s10 }
  0x8e   : > { %v331_v30 = vsub.f32 %v329_v28, %v330_v29  ;;  %s414_s22 = scalar_lea.sflag [#allocation5], %s1155_s14  ;;  %s778_s8 = scalar_lea.vmem %s1184_s10, 64 }
  0x8f   : > { %v324_v11 = vmul.f32 1.442695, %v323_v10  ;;  %p779_p4 = scmp.ne.s32.totalorder %s1184_s10, %s778_s8  ;;  %p1284_p12 = scmp.ne.s32.totalorder %s1275_s24, 0 }
  0x90   : > { %v351_v25 = vld [vmem:[#allocation2 + $0x4] sm:$0x3]  ;;  %v342_v38 = vld [vmem:[#allocation2] sm:$0x3]  ;;  %s894_s18 = smov [#allocation9]  }
  0x91   : > { %v347_v6 = vld [vmem:[#allocation2 + $0x2] sm:$0x3]  ;;  %682 = vpow2.f32 %v324_v11  ;;  %v358_v18 = vld [vmem:[#allocation2 + $0x6] sm:$0x3]  ;;  %p780_p13 = pnand %p779_p4, %p1284_p12  ;;  %s782_s7 = sshll.u32 %s894_s18, 4  ;;  %s783_s7 = int_to_ptr.vmem [resolvable:$false] %s782_s7 }
  0x92   : > { %v348_v9 = vadd.f32 %v347_v6, %v320_v7  ;;  %s784_s11 = scalar_lea.vmem %s783_s7, 128  ;;  %p785_p7 = scmp.lt.s32.totalorder %s1184_s10, %s783_s7 }
  0x93   : > { %p781_p6 = pneg %p780_p13  ;;  %p786_p0 = scmp.lt.s32.totalorder %s784_s11, %s778_s8 }
  0x94   : > { %349 = vst [vmem:[#allocation2 + $0x2] sm:$0x3] %v348_v9 }
  0x95   : > { %v679_v12 = vpop.eup %678  ;;  %p787_p9 = por %p786_p0, %p785_p7 }
  0x96   : > { %v681_v13 = vpop.eup %680  ;;  %v336_v14 = vmul.f32 0.5, %v679_v12 }
  0x97   : > { %v340_v15 = vmul.f32 0.5, %v681_v13  ;;  %p788_p8 = pnand %p787_p9, %p781_p6 }
  0x98   : > { %v337_v16 = vadd.f32 0.5, %v336_v14 }
  0x99   : > { %v341_v17 = vadd.f32 0.5, %v340_v15 }
  0x9b   : > { %v683_v19 = vpop.eup %682  ;;  %v352_v20 = vsub.f32 %v341_v17, %v337_v16  ;;  %v359_v21 = vadd.f32 %v341_v17, %v337_v16  ;;  %v377_v43 = vld [vmem:[#allocation2 + $0x2] sm:$0x3] }
  0x9c   : > { %v326_v22 = vadd.f32 1.0, %v683_v19  ;;  %v378_v45 = vsel %vm365_vm0, %v377_v43, 0.0 }
  0x9d   : > { %v353_v23 = vmul.f32 %v352_v20, %v320_v7  ;;  %v360_v24 = vadd.f32 %v359_v21, %v358_v18 }
  0x9e   : > { %684 = vlog2.f32 %v326_v22 }
  0x9f   : > { %v354_v26 = vadd.f32 %v353_v23, %v337_v16  ;;  %361 = vst [vmem:[#allocation2 + $0x6] sm:$0x3] %v360_v24 }
  0xa1   : > { %v355_v27 = vadd.f32 %v354_v26, %v351_v25 }
  0xa3   : > { %356 = vst [vmem:[#allocation2 + $0x4] sm:$0x3] %v355_v27 }
  0xa6   : > { %v401_v35 = vld [vmem:[#allocation2 + $0x6] sm:$0x3] }
  0xa7   : > { %v402_v39 = vsel %vm365_vm0, %v401_v35, 0.0 }
  0xa8   : > { %v685_v31 = vpop.eup %684 }
  0xa9   : > { %v328_v32 = vmul.f32 0.6931472, %v685_v31 }
  0xaa   : > { %v389_v34 = vld [vmem:[#allocation2 + $0x4] sm:$0x3] }
  0xab   : > { %v390_v36 = vsel %vm365_vm0, %v389_v34, 0.0  ;;  %v332_v37 = vadd.f32 %v331_v30, %v328_v32 }
  0xac   : > { %391 = vadd.xlane.f32.xlu1 %v390_v36 }
  0xad   : > { %v343_v40 = vmul.f32 %v333_v33, %v332_v37 }
  0xaf   : > { %v344_v41 = vadd.f32 %v343_v40, %v342_v38 }
  0xb0   : > { %403 = vadd.xlane.f32.xlu1 %v402_v39 }
  0xb1   : > { %345 = vst [vmem:[#allocation2] sm:$0x3] %v344_v41 }
  0xb8   : > { %v364_v42 = vld [vmem:[#allocation2] sm:$0x3] }
  0xb9   : > { %v366_v44 = vsel %vm365_vm0, %v364_v42, 0.0 }
  0xba   : > { %367 = vadd.xlane.f32.xlu0 %v366_v44 }
  0xbe   : > { %379 = vadd.xlane.f32.xlu0 %v378_v45 }
 0x139   : > { %v392_v46 = vpop.xlane.xlu1 %391 }
 0x13a   : > { %v393_v47 = vsel %vm365_vm0, %v392_v46, 0.0 }
 0x13b   : > { %v394_v48 = vrot.slane %v393_v47, 4 }
 0x13d   : > { %v395_v49 = vadd.f32 %v394_v48, %v393_v47  ;;  %v404_v50 = vpop.xlane.xlu1 %403 }
 0x13e   : > { %v405_v51 = vsel %vm365_vm0, %v404_v50, 0.0 }
 0x13f   : > { %v396_v52 = vrot.slane %v395_v49, 2  ;;  %v406_v53 = vrot.slane %v405_v51, 4 }
 0x141   : > { %v397_v54 = vadd.f32 %v396_v52, %v395_v49  ;;  %v407_v55 = vadd.f32 %v406_v53, %v405_v51 }
 0x143   : > { %v398_v56 = vrot.slane %v397_v54, 1  ;;  %v408_v57 = vrot.slane %v407_v55, 2 }
 0x145   : > { %v399_v58 = vadd.f32 %v398_v56, %v397_v54  ;;  %v409_v59 = vadd.f32 %v408_v57, %v407_v55 }
 0x147   : > { %400 = vst [vmem:[%s302_s12 + $0x2] sm:$0x1] %v399_v58  ;;  %v410_v60 = vrot.slane %v409_v59, 1  ;;  %v368_v61 = vpop.xlane.xlu0 %367 }
 0x148   : > { %v369_v62 = vsel %vm365_vm0, %v368_v61, 0.0 }
 0x149   : > { %v411_v63 = vadd.f32 %v410_v60, %v409_v59  ;;  %v370_v0 = vrot.slane %v369_v62, 4 }
 0x14b   : > { %412 = vst [vmem:[%s302_s12 + $0x3] sm:$0x1] %v411_v63  ;;  %v371_v1 = vadd.f32 %v370_v0, %v369_v62  ;;  %v380_v2 = vpop.xlane.xlu0 %379 }
 0x14c   : > { %v381_v3 = vsel %vm365_vm0, %v380_v2, 0.0 }
 0x14d   : > { %v372_v4 = vrot.slane %v371_v1, 2  ;;  %v382_v5 = vrot.slane %v381_v3, 4 }
 0x14f   : > { %v373_v6 = vadd.f32 %v372_v4, %v371_v1  ;;  %v383_v7 = vadd.f32 %v382_v5, %v381_v3 }
 0x151   : > { %v374_v8 = vrot.slane %v373_v6, 1  ;;  %v384_v9 = vrot.slane %v383_v7, 2 }
 0x153   : > { %v375_v10 = vadd.f32 %v374_v8, %v373_v6  ;;  %v385_v11 = vadd.f32 %v384_v9, %v383_v7 }
 0x155   : > { %376 = vst [vmem:[%s302_s12] sm:$0x1] %v375_v10  ;;  %v386_v12 = vrot.slane %v385_v11, 1 }
 0x157   : > { %v387_v13 = vadd.f32 %v386_v12, %v385_v11 }
 0x159   : > { %388 = vst [vmem:[%s302_s12 + $0x1] sm:$0x1] %v387_v13 }
 0x15a   : > { %791 = shalt.err (!%p788_p8)
}
 0x15b   : > { %s792_s29 = scalar_lea.hbm %s1182_s19, 64  ;;  %s796_s20 = scalar_lea.hbm %s1243_s3, 128 }
 0x15c   : > { %p793_p1 = scmp.ne.s32.totalorder %s1182_s19, %s792_s29  ;;  %p797_p2 = scmp.lt.u32.totalorder %s1182_s19, %s1243_s3 }
 0x15d   : > { %p798_p3 = scmp.lt.u32.totalorder %s796_s20, %s792_s29  ;;  %p800_p4 = scmp.lt.u32.totalorder %s792_s29, %s1182_s19 }
 0x15e   : > { %p794_p5 = pnand %p793_p1, %p1284_p12 }
 0x15f   : > { %p799_p11 = por %p798_p3, %p797_p2 }
 0x160   : > { %p795_p10 = pneg %p794_p5 }
 0x161   : > { %p801_p13 = por %p800_p4, %p799_p11 }
 0x163   : > { %p802_p6 = pnand %p801_p13, %p795_p10 }
 0x165   : > { %805 = shalt.err (!%p802_p6)
}
 0x166   : > { %587 = dma.vmem_to_hbm [thread:$0]  (%p1284_p12), %s1184_s10, 64, %s1182_s19, %s414_s22  }
 0x167 PF: > { %s1285_s26 = sld [smem:[#allocation16_spill]]  ;;  %s439_s28 = sand.u32 1, %s868_s15  }
 0x168   : > { %p1286_p7 = scmp.ne.s32.totalorder %s1276_s27, 0  ;;  %s440_s17 = scalar_lea.sflag [#allocation5], %s439_s28 }
 0x16d   : > { %p1287_p0 = scmp.ge.s32.totalorder %s1285_s26, 2 }
 0x16f   : > { %p600_p9 = pnand %p1287_p0, %p1286_p7 }
 0x171   : > { %851 = dma.done.wait (!%p600_p9), %s440_s17, 64  }
 0x172   : > { %853 = vsyncadd (!%p600_p9), %s440_s17, 4294967232  ;;  %s22_s20 = sadd.s32 1, %s1285_s26   ;;  %s1288_s23 = sld [smem:[#allocation13_spill]] }
 0x173   : > { %p19_p8 = scmp.ge.s32.totalorder %s22_s20, 4   ;;  %s1289_s14 = sld [smem:[#allocation18_spill]] }
 0x174   : > { %s1290_s24 = sld [smem:[#allocation14_spill]]  ;;  %s1291_s17 = sld [smem:[#allocation19_spill]] }
 0x175   : > { %s1292_s18 = sld [smem:[#allocation15_spill]]  ;;  %s1293_s19 = sld [smem:[#allocation17_spill]] }
 0x176   : > { %s1294_s12 = smov %s860_s13  ;;  %s1296_s15 = smov %s872_s16 }
 0x177   :  { %21 = sbr.rel (!%p19_p8) target bundleno = 12 (0xc), region = 112 }
 0x178   : > { %s1295_s13 = smov %s1288_s23 }
 0x17a   : > { %s1297_s16 = smov %s1290_s24 }
 0x17e   :  { %445 = vsyncpa [#allocation4], 1 }
 0x17f   :  { %447 = vsyncpa [#allocation4 + $0x1], 1 }
 0x180   :  { %448 = vsyncpa [#allocation7], 1 }
 0x181   :  { %450 = vsyncpa [#allocation7 + $0x1], 1 }
 0x182   :  { %451 = vsyncpa [#allocation5], 1 }
 0x183   :  { %453 = vsyncpa [#allocation5 + $0x1], 1 }

</bundles_post_ra>
